<compile_context>
chip_gen: v6e
topology: v6e:2x2x1
jax: 0.10.0
libtpu: 0.0.40
codegen_flags: <defaults>
</compile_context>

<pallas_src>
import functools
import math

import jax
import jax.numpy as jnp
from jax.experimental import pallas as pl
from jax.experimental.pallas import tpu as pltpu


def _round_up(a, b):
    return (a + b - 1) // b * b


def _label_smoothing_kernel(x_ref, tgt_ref, out_ref, *,
                            confidence, base, conf_xlogy, base_xlogy,
                            padding_idx, num_classes, check_class_bound):
    j = pl.program_id(1)          # class-tile index (trailing reduction axis)

    @pl.when(j == 0)
    def _init():
        out_ref[...] = jnp.zeros_like(out_ref)

    x = x_ref[...].astype(jnp.float32)     # (bm, sp, tv) log-probs
    tgt = tgt_ref[...]                     # (bm, sp, 1) int32 targets
    bm, sp, tv = x.shape

    col = jax.lax.broadcasted_iota(jnp.int32, (bm, sp, tv), 2) + j * tv
    is_tgt = col == tgt

    # true_dist only ever takes the values {0, base, confidence}: select between
    # host-precomputed constants instead of building/scattering it + jnp.log.
    t_val = jnp.where(is_tgt, confidence, base)         # t
    ent = jnp.where(is_tgt, conf_xlogy, base_xlogy)     # xlogy(t, t)

    mask = (col != padding_idx) & (tgt != padding_idx)
    if check_class_bound:                 # only when the class dim was padded
        mask = mask & (col < num_classes)

    pointwise = jnp.where(mask, ent - t_val * x, 0.0)

    # Reduce only over the major axis (pure vreg adds); accumulate into the
    # resident output block (same block index for every j).
    out_ref[0] += pointwise.sum(axis=0)


def label_smoothing_loss(x, target, *, size, padding_idx, smoothing,
                         tm=None, tv=None):
    """x: (N, size) log-probs (f32 or bf16); target: (N,) int labels. Scalar loss."""
    n, v = x.shape
    assert v == size and size > 2

    itemsize = jnp.dtype(x.dtype).itemsize
    sp = {4: 8, 2: 16, 1: 32}.get(itemsize, 8)   # sublane pack per dtype width

    # ---- class tiling (keep tiles large but VMEM-safe for big vocabs) ----
    if tv is None:
        tv = _round_up(v, 128) if v <= 4096 else 2048
    tv = _round_up(tv, 128)
    v_pad = _round_up(v, tv)
    tv = min(tv, v_pad)

    # ---- row tiling: target ~2 MiB per x block (amortizes per-step overhead,
    # double-buffered it still fits the 16 MiB v5e default scoped VMEM) ----
    if tm is None:
        target_bytes = 2 << 20
        tm = max(sp, (target_bytes // (tv * itemsize)) // sp * sp)
    tm = max(sp, (tm // sp) * sp)
    tm = min(tm, _round_up(n, sp))
    n_pad = _round_up(n, tm)

    # ---- pad: extra rows get target=padding_idx (contribute 0); extra class
    # columns are masked out inside the kernel ----
    x_p = x
    if (n_pad, v_pad) != (n, v):
        x_p = jnp.zeros((n_pad, v_pad), x.dtype).at[:n, :v].set(x)
    t_p = jnp.full((n_pad,), int(padding_idx), jnp.int32).at[:n].set(
        target.astype(jnp.int32))

    # Free row-major reshapes so the kernel's partial reduce is over a major dim.
    x3 = x_p.reshape(n_pad // sp, sp, v_pad)
    t3 = t_p.reshape(n_pad // sp, sp, 1)

    confidence = 1.0 - float(smoothing)
    base = float(smoothing) / (size - 2)
    conf_xlogy = confidence * math.log(confidence) if confidence > 0.0 else 0.0
    base_xlogy = base * math.log(base) if base > 0.0 else 0.0

    kernel = functools.partial(
        _label_smoothing_kernel,
        confidence=confidence, base=base,
        conf_xlogy=conf_xlogy, base_xlogy=base_xlogy,
        padding_idx=int(padding_idx), num_classes=int(size),
        check_class_bound=(v_pad != v))

    grid_rows = n_pad // tm
    grid_cols = v_pad // tv

    partials = pl.pallas_call(
        kernel,
        out_shape=jax.ShapeDtypeStruct((grid_rows, sp, tv), jnp.float32),
        grid_spec=pltpu.PrefetchScalarGridSpec(
            num_scalar_prefetch=0,
            grid=(grid_rows, grid_cols),
            in_specs=[
                pl.BlockSpec((tm // sp, sp, tv), lambda i, j: (i, 0, j)),
                pl.BlockSpec((tm // sp, sp, 1), lambda i, j: (i, 0, 0)),
            ],
            out_specs=pl.BlockSpec((1, sp, tv), lambda i, j: (i, 0, 0)),
        ),
        compiler_params=pltpu.CompilerParams(
            dimension_semantics=("parallel", "arbitrary")),
    )(x3, t3)

    # Tiny final reduction over the per-row-tile partial blocks.
    return jnp.sum(partials)


def _reference_loss(x, target, *, size, padding_idx, smoothing):
    n, v = x.shape
    confidence = 1.0 - smoothing
    base = smoothing / (size - 2)
    td = jnp.full((n, v), base, dtype=jnp.float32)
    td = td.at[jnp.arange(n), target].set(confidence)
    td = td.at[:, padding_idx].set(0.0)
    td = jnp.where((target == padding_idx)[:, None], 0.0, td)
    safe = jnp.where(td > 0, td, 1.0)
    return jnp.sum(jnp.where(td > 0, td * (jnp.log(safe) - x.astype(jnp.float32)), 0.0))


if __name__ == "__main__":
    PADDING_IDX = 0
    SMOOTHING = 0.1
    key = jax.random.PRNGKey(0)

    # Case 1: aligned small shapes (size = vocab classes).
    SIZE, N = 128, 16
    k1, k2, key = jax.random.split(key, 3)
    logits = jax.random.normal(k1, (N, SIZE), dtype=jnp.float32)
    x = jax.nn.log_softmax(logits, axis=-1)          # KLDivLoss expects log-probs
    target = jax.random.randint(k2, (N,), 0, SIZE, dtype=jnp.int32)
    target = target.at[3].set(PADDING_IDX).at[11].set(PADDING_IDX)

    loss = label_smoothing_loss(x, target, size=SIZE,
                                padding_idx=PADDING_IDX, smoothing=SMOOTHING)
    loss = jax.block_until_ready(loss)
    ref = _reference_loss(x, target, size=SIZE,
                          padding_idx=PADDING_IDX, smoothing=SMOOTHING)
    assert jnp.allclose(loss, ref, rtol=1e-5, atol=1e-4), (loss, ref)

    # Case 2: ragged shapes exercising the row/class padding paths.
    SIZE2, N2 = 120, 10
    k3, k4, key = jax.random.split(key, 3)
    logits2 = jax.random.normal(k3, (N2, SIZE2), dtype=jnp.float32)
    x2 = jax.nn.log_softmax(logits2, axis=-1)
    target2 = jax.random.randint(k4, (N2,), 0, SIZE2, dtype=jnp.int32)
    target2 = target2.at[0].set(PADDING_IDX)

    loss2 = label_smoothing_loss(x2, target2, size=SIZE2,
                                 padding_idx=PADDING_IDX, smoothing=SMOOTHING)
    loss2 = jax.block_until_ready(loss2)
    ref2 = _reference_loss(x2, target2, size=SIZE2,
                           padding_idx=PADDING_IDX, smoothing=SMOOTHING)
    assert jnp.allclose(loss2, ref2, rtol=1e-5, atol=1e-4), (loss2, ref2)

    # Case 3: multiple class tiles (exercises accumulation across the
    # "arbitrary" class-tile axis into the resident output block).
    SIZE3, N3 = 384, 24
    k5, k6, key = jax.random.split(key, 3)
    logits3 = jax.random.normal(k5, (N3, SIZE3), dtype=jnp.float32)
    x3 = jax.nn.log_softmax(logits3, axis=-1)
    target3 = jax.random.randint(k6, (N3,), 0, SIZE3, dtype=jnp.int32)
    target3 = target3.at[5].set(PADDING_IDX)

    loss3 = label_smoothing_loss(x3, target3, size=SIZE3,
                                 padding_idx=PADDING_IDX, smoothing=SMOOTHING,
                                 tv=128)
    loss3 = jax.block_until_ready(loss3)
    ref3 = _reference_loss(x3, target3, size=SIZE3,
                           padding_idx=PADDING_IDX, smoothing=SMOOTHING)
    assert jnp.allclose(loss3, ref3, rtol=1e-5, atol=1e-4), (loss3, ref3)

    # TODO(synk): the module also caches self.true_dist (a training-time side
    # effect); only the returned loss is computed here.
    print("KERNEL_OK")
</pallas_src>

<mosaic_0001>
module attributes {stable_mosaic.version = 11 : i64} {
  func.func @_label_smoothing_kernel(%arg0: i32, %arg1: i32, %arg2: memref<2x8x128xf32, #tpu.memory_space<vmem>>, %arg3: memref<2x8x1xi32, #tpu.memory_space<vmem>>, %arg4: memref<1x8x128xf32, #tpu.memory_space<vmem>>) attributes {dimension_semantics = [#tpu.dimension_semantics<parallel>, #tpu.dimension_semantics<arbitrary>], iteration_bounds = array<i64: 1, 1>, scalar_prefetch = 0 : i64, scratch_operands = 0 : i64, tpu.core_type = #tpu.core_type<tc>, window_params = [{transform_indices = @transform_0, window_bounds = array<i64: 2, 8, 128>}, {transform_indices = @transform_1, window_bounds = array<i64: 2, 8, 1>}, {transform_indices = @transform_2, window_bounds = array<i64: 1, 8, 128>}]} {
    %c0_i32 = arith.constant 0 : i32
    %0 = arith.cmpi eq, %arg1, %c0_i32 : i32
    %1 = arith.extui %0 : i1 to i32
    %c0_i32_0 = arith.constant 0 : i32
    %2 = arith.cmpi ne, %1, %c0_i32_0 : i32
    scf.if %2 {
      %cst_19 = arith.constant 0.000000e+00 : f32
      %34 = vector.broadcast %cst_19 : f32 to vector<1x8x128xf32>
      %c0_20 = arith.constant 0 : index
      %c0_21 = arith.constant 0 : index
      %c0_22 = arith.constant 0 : index
      %35 = vector.load %arg4[%c0_20, %c0_21, %c0_22] : memref<1x8x128xf32, #tpu.memory_space<vmem>>, vector<1x8x128xf32>
      tpu.vector_store %arg4[%c0_20, %c0_21, %c0_22], %34 {strides = array<i32>} : memref<1x8x128xf32, #tpu.memory_space<vmem>>, vector<1x8x128xf32>,
    } else {
    }
    %c0 = arith.constant 0 : index
    %c0_1 = arith.constant 0 : index
    %c0_2 = arith.constant 0 : index
    %3 = vector.load %arg2[%c0, %c0_1, %c0_2] : memref<2x8x128xf32, #tpu.memory_space<vmem>>, vector<2x8x128xf32>
    %c0_3 = arith.constant 0 : index
    %c0_4 = arith.constant 0 : index
    %c0_5 = arith.constant 0 : index
    %4 = vector.load %arg3[%c0_3, %c0_4, %c0_5] : memref<2x8x1xi32, #tpu.memory_space<vmem>>, vector<2x8x1xi32>
    %5 = tpu.iota {dimensions = array<i32: 2>} : vector<2x8x128xi32>
    %c128_i32 = arith.constant 128 : i32
    %6 = arith.muli %arg1, %c128_i32 : i32
    %7 = vector.broadcast %6 : i32 to vector<2x8x128xi32>
    %8 = arith.addi %5, %7 : vector<2x8x128xi32>
    %9 = vector.broadcast %4 : vector<2x8x1xi32> to vector<2x8x128xi32>
    %10 = arith.cmpi eq, %8, %9 : vector<2x8x128xi32>
    %cst = arith.constant 0.899999976 : f32
    %cst_6 = arith.constant 7.93650805E-4 : f32
    %11 = vector.broadcast %cst : f32 to vector<2x8x128xf32>
    %12 = vector.broadcast %cst_6 : f32 to vector<2x8x128xf32>
    %13 = arith.select %10, %11, %12 : vector<2x8x128xi1>, vector<2x8x128xf32>
    %cst_7 = arith.constant -0.0948244631 : f32
    %cst_8 = arith.constant -0.00566576747 : f32
    %14 = vector.broadcast %cst_7 : f32 to vector<2x8x128xf32>
    %15 = vector.broadcast %cst_8 : f32 to vector<2x8x128xf32>
    %16 = arith.select %10, %14, %15 : vector<2x8x128xi1>, vector<2x8x128xf32>
    %c0_i32_9 = arith.constant 0 : i32
    %17 = vector.broadcast %c0_i32_9 : i32 to vector<2x8x128xi32>
    %18 = arith.cmpi ne, %8, %17 : vector<2x8x128xi32>
    %c0_i32_10 = arith.constant 0 : i32
    %19 = vector.broadcast %c0_i32_10 : i32 to vector<2x8x1xi32>
    %20 = arith.cmpi ne, %4, %19 : vector<2x8x1xi32>
    %21 = vector.broadcast %20 : vector<2x8x1xi1> to vector<2x8x128xi1>
    %22 = arith.andi %18, %21 : vector<2x8x128xi1>
    %23 = arith.mulf %13, %3 : vector<2x8x128xf32>
    %24 = arith.subf %16, %23 : vector<2x8x128xf32>
    %cst_11 = arith.constant 0.000000e+00 : f32
    %25 = vector.broadcast %cst_11 : f32 to vector<2x8x128xf32>
    %26 = arith.select %22, %24, %25 : vector<2x8x128xi1>, vector<2x8x128xf32>
    %c0_12 = arith.constant 0 : index
    %c0_13 = arith.constant 0 : index
    %c0_14 = arith.constant 0 : index
    %27 = vector.load %arg4[%c0_12, %c0_13, %c0_14] : memref<1x8x128xf32, #tpu.memory_space<vmem>>, vector<1x8x128xf32>
    %28 = vector.shape_cast %27 : vector<1x8x128xf32> to vector<8x128xf32>
    %cst_15 = arith.constant dense<0.000000e+00> : vector<8x128xf32>
    %29 = vector.multi_reduction <add>, %26, %cst_15 [0] : vector<2x8x128xf32> to vector<8x128xf32>
    %30 = arith.addf %28, %29 : vector<8x128xf32>
    %c0_16 = arith.constant 0 : index
    %c0_17 = arith.constant 0 : index
    %c0_18 = arith.constant 0 : index
    %31 = vector.load %arg4[%c0_16, %c0_17, %c0_18] : memref<1x8x128xf32, #tpu.memory_space<vmem>>, vector<1x8x128xf32>
    %32 = vector.shape_cast %31 : vector<1x8x128xf32> to vector<8x128xf32>
    %33 = vector.shape_cast %30 : vector<8x128xf32> to vector<1x8x128xf32>
    tpu.vector_store %arg4[%c0_16, %c0_17, %c0_18], %33 {strides = array<i32>} : memref<1x8x128xf32, #tpu.memory_space<vmem>>, vector<1x8x128xf32>,
    return
  }
  func.func @transform_0(%arg0: i32, %arg1: i32) -> (i32, i32, i32) {
    %c0_i32 = arith.constant 0 : i32
    %c0_i32_0 = arith.constant 0 : i32
    return %arg0, %c0_i32, %arg1 : i32, i32, i32
  }
  func.func @transform_1(%arg0: i32, %arg1: i32) -> (i32, i32, i32) {
    %c0_i32 = arith.constant 0 : i32
    %c0_i32_0 = arith.constant 0 : i32
    %c0_i32_1 = arith.constant 0 : i32
    return %arg0, %c0_i32, %c0_i32_0 : i32, i32, i32
  }
  func.func @transform_2(%arg0: i32, %arg1: i32) -> (i32, i32, i32) {
    %c0_i32 = arith.constant 0 : i32
    %c0_i32_0 = arith.constant 0 : i32
    %c0_i32_1 = arith.constant 0 : i32
    return %arg0, %c0_i32, %c0_i32_0 : i32, i32, i32
  }
}

</mosaic_0001>

<bundles_post_ra>
// kernel: tpu_custom_call.1
= control target key start
LH: loop header
LB: loop body
LE: loop exit
PB: predicated region body
PF: predicated region fallthrough
CT: control target
= control target key end

     0   :  { %v106_v2 = vmov 0   ;;  %s140_s0 = inlined_call_operand.vmem [shape: f32[2,8,128], index: 0, kind: input, shape index: {}]   ;;  %s141_s1 = inlined_call_operand.vmem [shape: s32[2,8,1], index: 1, kind: input, shape index: {}]   ;;  %s142_s2 = inlined_call_operand.hbm [shape: f32[1,8,128], index: 2, kind: output, shape index: {}]  }
   0x1   :  { %v19_v0 = vld [vmem:[%s141_s1] sm:$0xff]  ;;  %v20_v1 = vld [vmem:[%s141_s1 + $0x8] sm:$0xff]  ;;  %82 = vset.pattern.permute.xlu0 %v106_v2  ;;  %83 = vset.pattern.permute.xlu1 %v106_v2 }
   0x2   :  { %vm39_vm0 = vcmp.ne.s32.totalorder %v19_v0, 0  ;;  %vm40_vm1 = vcmp.ne.s32.totalorder %v20_v1, 0 }
   0x3   :  { %7 = vsyncpa [#allocation3], 0  ;;  %27 = vperm.xlu0 %82, %v19_v0   ;;  %v41_v3 = vsel %vm39_vm0, 1, %v106_v2  ;;  %v42_v4 = vsel %vm40_vm1, 1, %v106_v2  ;;  %v21_v5 = vlaneseq  ;;  %v17_v8 = vld [vmem:[%s140_s0] sm:$0xff]  ;;  %v18_v14 = vld [vmem:[%s140_s0 + $0x8] sm:$0xff] }
   0x4   :  { %44 = vperm.xlu1 %83, %v41_v3   ;;  %v107_v10 = vmov 0.0007936508   ;;  %v108_v16 = vmov -0.0056657675   ;;  %s109_s16 = smov [#allocation2]  }
   0x5   :  { %v22_v6 = vand.u32 127, %v21_v5  ;;  %s69_s17 = sshll.u32 %s109_s16, 4  ;;  %s70_s17 = int_to_ptr.vmem [resolvable:$true] %s69_s17 }
   0x6   :  { %s84_s0 = scalar_lea.vmem %s70_s17, 128  ;;  %p89_p1 = scmp.lt.s32.totalorder %s70_s17, %s70_s17 }
   0x7   :  { %30 = vperm.xlu0 %82, %v20_v1   ;;  %vm38_vm3 = vcmp.ne.s32.totalorder %v22_v6, 0  ;;  %p85_p0 = scmp.ne.s32.totalorder %s70_s17, %s84_s0  ;;  %p90_p2 = scmp.lt.s32.totalorder %s84_s0, %s84_s0 }
   0x8   :  { %47 = vperm.xlu1 %83, %v42_v4  }
   0x9   :  { %p91_p3 = por %p90_p2, %p89_p1 }
   0xb   :  { %p92_p4 = pnand %p91_p3, %p85_p0 }
  0x7e   :  { %v28_v7 = vpop.permute.xlu0 %27 }
  0x7f   :  { %vm32_vm2 = vcmp.eq.s32.totalorder %v22_v6, %v28_v7  ;;  %v45_v9 = vpop.permute.xlu1 %44 }
  0x80   :  { %v34_v11 = vsel %vm32_vm2, 0.9, %v107_v10  ;;  %vm49_vm4 = vcmp.eq.s32.totalorder %v45_v9, 1  ;;  %v36_v17 = vsel %vm32_vm2, -0.09482446, %v108_v16 }
  0x81   :  { %v53_v12 = vmul.f32 %v34_v11, %v17_v8  ;;  %vm51_vm7 = vmand %vm38_vm3, %vm49_vm4 }
  0x82   :  { %v31_v13 = vpop.permute.xlu0 %30 }
  0x83   :  { %vm33_vm5 = vcmp.eq.s32.totalorder %v22_v6, %v31_v13  ;;  %v48_v15 = vpop.permute.xlu1 %47  ;;  %v55_v19 = vsub.f32 %v36_v17, %v53_v12 }
  0x84   :  { %v35_v18 = vsel %vm33_vm5, 0.9, %v107_v10  ;;  %vm50_vm6 = vcmp.eq.s32.totalorder %v48_v15, 1  ;;  %v37_v21 = vsel %vm33_vm5, -0.09482446, %v108_v16 }
  0x85   :  { %v54_v20 = vmul.f32 %v35_v18, %v18_v14  ;;  %vm52_vm8 = vmand %vm38_vm3, %vm50_vm6  ;;  %v57_v23 = vsel %vm51_vm7, %v55_v19, 0.0 }
  0x87   :  { %v56_v22 = vsub.f32 %v37_v21, %v54_v20 }
  0x89   :  { %v58_v24 = vsel %vm52_vm8, %v56_v22, 0.0 }
  0x8a   :  { %v60_v25 = vadd.f32 %v58_v24, %v57_v23 }
  0x8c   :  { %62 = vst [vmem:[#allocation2] sm:$0xff] %v60_v25 }
  0x8d   :  { %95 = shalt.err (!%p92_p4)
}
  0x8e   :  { %72 = dma.vmem_to_hbm [thread:$0]  %s70_s17, 128, %s142_s2, [#allocation3]  }
  0x8f   :  { %104 = dma.done.wait [#allocation3], 128  }
  0x90   :  { %105 = vsyncadd [#allocation3], 4294967168 }
  0x91   :  { %76 = vsyncpa [#allocation3], 1 }

</bundles_post_ra>
